<compile_context>
chip_gen: v7x
topology: tpu7x:2x2x1
jax: 0.10.0
libtpu: 0.0.40
codegen_flags: <defaults>
</compile_context>

<pallas_src>
import functools

import jax
import jax.numpy as jnp
from jax.experimental import pallas as pl
from jax.experimental.pallas import tpu as pltpu


_LANE = 128  # lane-dense width (one full vreg lane group)


def _device_kind() -> str:
    try:
        return jax.devices()[0].device_kind.lower()
    except Exception:  # pragma: no cover - defensive only
        return ""


def _default_row_tile(kind: str) -> int:
    # 2 MiB f32 blocks on v6e/v7x, 1 MiB on v5* (16 MiB scoped-VMEM default).
    return 2048 if "v5" in kind else 4096


def _default_num_partitions(kind: str) -> int:
    # Only v7x has 2 TensorCores per chip; elsewhere a parallel axis is just a
    # serial outer loop.
    return 2 if "v7" in kind else 1


def _pinball(err, tau):
    # maximum(tau*e, (tau-1)*e) == e * (tau if e >= 0 else tau - 1): one mul.
    return err * jnp.where(err >= 0, jnp.float32(tau), jnp.float32(tau - 1.0))


def _pinball_single_block_kernel(yt_ref, yp_ref, out_ref, *, tau):
    err = yt_ref[...].astype(jnp.float32) - yp_ref[...].astype(jnp.float32)
    out_ref[0, 0] = jnp.sum(_pinball(err, tau))


def _pinball_tiled_kernel(yt_ref, yp_ref, out_ref, acc_ref, *,
                          tau, steps, n_blocks, edge_rows, guard_full):
    i = pl.program_id(1)
    block_idx = pl.program_id(0) * steps + i

    @pl.when(i == 0)
    def _init():
        acc_ref[...] = jnp.zeros_like(acc_ref)

    def _accum_full():
        err = yt_ref[...].astype(jnp.float32) - yp_ref[...].astype(jnp.float32)
        acc_ref[...] += _pinball(err, tau)

    if guard_full:
        n_full = n_blocks - 1 if edge_rows > 0 else n_blocks
        pl.when(block_idx < n_full)(_accum_full)
    else:
        _accum_full()

    if edge_rows > 0:
        # Partial last row-block: 8-row-aligned prefix + one masked 8-row group.
        e_lo = (edge_rows // 8) * 8
        e_rem = edge_rows - e_lo

        @pl.when(block_idx == n_blocks - 1)
        def _edge():
            if e_lo > 0:
                err = (yt_ref[:e_lo, :].astype(jnp.float32)
                       - yp_ref[:e_lo, :].astype(jnp.float32))
                acc_ref[:e_lo, :] += _pinball(err, tau)
            if e_rem > 0:
                err = (yt_ref[e_lo:e_lo + 8, :].astype(jnp.float32)
                       - yp_ref[e_lo:e_lo + 8, :].astype(jnp.float32))
                loss = _pinball(err, tau)
                rid = jax.lax.broadcasted_iota(jnp.int32, loss.shape, 0)
                acc_ref[e_lo:e_lo + 8, :] += jnp.where(rid < e_rem, loss,
                                                       jnp.float32(0.0))

    @pl.when(i == steps - 1)
    def _fin():
        out_ref[0, 0] = jnp.sum(acc_ref[...])


def pinball_loss(y_true, y_pred, tau: float, *,
                 row_tile: int | None = None,
                 num_partitions: int | None = None):
    """Pinball (quantile) loss, mean over all elements. Returns f32 scalar."""
    tau = float(tau)
    if not 0.0 < tau < 1.0:
        raise ValueError("tau must be between 0 and 1")
    if y_true.shape != y_pred.shape:
        raise ValueError("y_true and y_pred must have the same shape")

    kind = _device_kind()
    if row_tile is None:
        row_tile = _default_row_tile(kind)
    row_tile = max(16, (int(row_tile) // 16) * 16)
    if num_partitions is None:
        num_partitions = _default_num_partitions(kind)
    num_partitions = max(1, int(num_partitions))

    total = int(y_true.size)
    inv_count = 1.0 / float(total)

    # Zero-copy flatten in the NATIVE dtype (cast happens inside the kernel).
    yt = y_true.reshape(-1)
    yp = y_pred.reshape(-1)

    rows = total // _LANE
    main = rows * _LANE
    rem = total - main

    # Remainder (< 128 elements): tiny fused jnp expression, no padding.
    if rem:
        t_err = yt[main:].astype(jnp.float32) - yp[main:].astype(jnp.float32)
        tail = jnp.sum(_pinball(t_err, tau))
    else:
        tail = jnp.float32(0.0)

    if rows == 0:
        # Input smaller than one 128-lane row; nothing for the kernel to do.
        return tail * jnp.float32(inv_count)

    yt_main = yt if rem == 0 else yt[:main]   # zero-copy reshape when aligned
    yp_main = yp if rem == 0 else yp[:main]
    yt2 = yt_main.reshape(rows, _LANE)
    yp2 = yp_main.reshape(rows, _LANE)

    itemsize = jnp.dtype(yt2.dtype).itemsize
    cost = pl.CostEstimate(flops=5 * main, transcendentals=0,
                           bytes_accessed=2 * main * itemsize + 8)

    if rows <= row_tile:
        # Single-block path: block == full array dims (no (8,128) constraint).
        out = pl.pallas_call(
            functools.partial(_pinball_single_block_kernel, tau=tau),
            out_shape=jax.ShapeDtypeStruct((1, 1), jnp.float32),
            grid_spec=pltpu.PrefetchScalarGridSpec(
                num_scalar_prefetch=0,
                grid=(1,),
                in_specs=[
                    pl.BlockSpec((rows, _LANE), lambda i: (0, 0)),
                    pl.BlockSpec((rows, _LANE), lambda i: (0, 0)),
                ],
                out_specs=pl.BlockSpec((1, 1), lambda i: (0, 0),
                                       memory_space=pltpu.SMEM),
            ),
            compiler_params=pltpu.CompilerParams(
                dimension_semantics=("arbitrary",)),
            cost_estimate=cost,
        )(yt2, yp2)
        return (out[0, 0] + tail) * jnp.float32(inv_count)

    # Tiled path: (row_tile, 128) blocks, masked partial edge block, f32 VMEM
    # accumulator, optional dual-TC parallel axis (v7x only).
    n_blocks = -(-rows // row_tile)
    steps = -(-n_blocks // num_partitions)
    edge_rows = rows - (n_blocks - 1) * row_tile
    if edge_rows == row_tile:
        edge_rows = 0
    guard_full = (edge_rows > 0) or (num_partitions * steps > n_blocks)

    def in_map(p, i, steps=steps, hi=n_blocks - 1):
        # Clamp so a (skipped) overshoot step never requests an OOB block.
        return (jnp.minimum(p * steps + i, hi), 0)

    partials = pl.pallas_call(
        functools.partial(_pinball_tiled_kernel, tau=tau, steps=steps,
                          n_blocks=n_blocks, edge_rows=edge_rows,
                          guard_full=guard_full),
        out_shape=jax.ShapeDtypeStruct((num_partitions, 1), jnp.float32),
        grid_spec=pltpu.PrefetchScalarGridSpec(
            num_scalar_prefetch=0,
            grid=(num_partitions, steps),
            in_specs=[
                pl.BlockSpec((row_tile, _LANE), in_map),
                pl.BlockSpec((row_tile, _LANE), in_map),
            ],
            out_specs=pl.BlockSpec((1, 1), lambda p, i: (p, 0),
                                   memory_space=pltpu.SMEM),
            scratch_shapes=[pltpu.VMEM((row_tile, _LANE), jnp.float32)],
        ),
        compiler_params=pltpu.CompilerParams(
            dimension_semantics=("parallel", "arbitrary")),
        cost_estimate=cost,
    )(yt2, yp2)
    return (jnp.sum(partials) + tail) * jnp.float32(inv_count)


def pinball_loss_ref(y_true, y_pred, tau: float):
    err = y_true.astype(jnp.float32) - y_pred.astype(jnp.float32)
    return jnp.mean(jnp.maximum(tau * err, (tau - 1.0) * err))


if __name__ == "__main__":
    tau = 0.3  # deterministic "module parameter": quantile level

    key = jax.random.PRNGKey(0)
    k1, k2, k3, k4, k5, k6 = jax.random.split(key, 6)

    # (N, T) = (256, 3) as in the module docstring -> single-block path.
    y_true = jax.random.normal(k1, (256, 3), dtype=jnp.float32)
    y_pred = jax.random.normal(k2, (256, 3), dtype=jnp.float32)
    out = jax.block_until_ready(pinball_loss(y_true, y_pred, tau))
    ref = pinball_loss_ref(y_true, y_pred, tau)
    assert jnp.allclose(out, ref, rtol=1e-5, atol=1e-6), (out, ref)

    # Ragged larger case: forces the tiled path at test size (small row_tile),
    # exercises the masked partial edge block, the overshoot guard (on v7x)
    # and the <128-element jnp tail.
    y_true_l = jax.random.normal(k3, (2049, 130), dtype=jnp.float32)
    y_pred_l = jax.random.normal(k4, (2049, 130), dtype=jnp.float32)
    out_l = jax.block_until_ready(
        pinball_loss(y_true_l, y_pred_l, tau, row_tile=512))
    ref_l = pinball_loss_ref(y_true_l, y_pred_l, tau)
    assert jnp.allclose(out_l, ref_l, rtol=1e-5, atol=1e-6), (out_l, ref_l)

    # Native bf16 streaming (no wrapper-side upcast; cast inside the kernel).
    y_true_b = jax.random.normal(k5, (512, 6), dtype=jnp.bfloat16)
    y_pred_b = jax.random.normal(k6, (512, 6), dtype=jnp.bfloat16)
    out_b = jax.block_until_ready(pinball_loss(y_true_b, y_pred_b, tau))
    ref_b = pinball_loss_ref(y_true_b, y_pred_b, tau)
    assert jnp.allclose(out_b, ref_b, rtol=1e-4, atol=1e-5), (out_b, ref_b)

    print("KERNEL_OK")
</pallas_src>

<mosaic_0001>
module attributes {stable_mosaic.version = 11 : i64} {
  func.func @_pinball_single_block_kernel(%arg0: i32, %arg1: memref<6x128xf32, #tpu.memory_space<vmem>>, %arg2: memref<6x128xf32, #tpu.memory_space<vmem>>, %arg3: memref<1x1xf32, #tpu.memory_space<smem>>) attributes {dimension_semantics = [#tpu.dimension_semantics<arbitrary>], iteration_bounds = array<i64: 1>, scalar_prefetch = 0 : i64, scratch_operands = 0 : i64, tpu.core_type = #tpu.core_type<tc>, window_params = [{pipeline_mode = #tpu.pipeline_mode<synchronous>, transform_indices = @transform_0, window_bounds = array<i64: 6, 128>}, {pipeline_mode = #tpu.pipeline_mode<synchronous>, transform_indices = @transform_1, window_bounds = array<i64: 6, 128>}, {transform_indices = @transform_2, window_bounds = array<i64: 1, 1>}]} {
    %c0 = arith.constant 0 : index
    %c0_0 = arith.constant 0 : index
    %0 = vector.load %arg1[%c0, %c0_0] : memref<6x128xf32, #tpu.memory_space<vmem>>, vector<6x128xf32>
    %c0_1 = arith.constant 0 : index
    %c0_2 = arith.constant 0 : index
    %1 = vector.load %arg2[%c0_1, %c0_2] : memref<6x128xf32, #tpu.memory_space<vmem>>, vector<6x128xf32>
    %2 = arith.subf %0, %1 : vector<6x128xf32>
    %cst = arith.constant 0.000000e+00 : f32
    %3 = vector.broadcast %cst : f32 to vector<6x128xf32>
    %4 = arith.cmpf oge, %2, %3 : vector<6x128xf32>
    %cst_3 = arith.constant 3.000000e-01 : f32
    %cst_4 = arith.constant -0.699999988 : f32
    %5 = vector.broadcast %cst_3 : f32 to vector<6x128xf32>
    %6 = vector.broadcast %cst_4 : f32 to vector<6x128xf32>
    %7 = arith.select %4, %5, %6 : vector<6x128xi1>, vector<6x128xf32>
    %8 = arith.mulf %2, %7 : vector<6x128xf32>
    %9 = vector.shape_cast %8 : vector<6x128xf32> to vector<1x6x128xf32>
    %cst_5 = arith.constant dense<0.000000e+00> : vector<1xf32>
    %10 = vector.multi_reduction <add>, %9, %cst_5 [1, 2] : vector<1x6x128xf32> to vector<1xf32>
    %11 = vector.shape_cast %10 : vector<1xf32> to vector<1x1x1xf32>
    %12 = vector.extract %11[0, 0, 0] : f32 from vector<1x1x1xf32>
    %c0_6 = arith.constant 0 : index
    %c0_7 = arith.constant 0 : index
    %13 = memref.load %arg3[%c0_6, %c0_7] : memref<1x1xf32, #tpu.memory_space<smem>>
    memref.store %12, %arg3[%c0_6, %c0_7] : memref<1x1xf32, #tpu.memory_space<smem>>
    return
  }
  func.func @transform_0(%arg0: i32) -> (i32, i32) {
    %c0_i32 = arith.constant 0 : i32
    %c0_i32_0 = arith.constant 0 : i32
    %c0_i32_1 = arith.constant 0 : i32
    return %c0_i32, %c0_i32_0 : i32, i32
  }
  func.func @transform_1(%arg0: i32) -> (i32, i32) {
    %c0_i32 = arith.constant 0 : i32
    %c0_i32_0 = arith.constant 0 : i32
    %c0_i32_1 = arith.constant 0 : i32
    return %c0_i32, %c0_i32_0 : i32, i32
  }
  func.func @transform_2(%arg0: i32) -> (i32, i32) {
    %c0_i32 = arith.constant 0 : i32
    %c0_i32_0 = arith.constant 0 : i32
    %c0_i32_1 = arith.constant 0 : i32
    return %c0_i32, %c0_i32_0 : i32, i32
  }
}

</mosaic_0001>

<bundles_post_ra>
// kernel: tpu_custom_call.1
= control target key start
LH: loop header
LB: loop body
LE: loop exit
PB: predicated region body
PF: predicated region fallthrough
CT: control target
= control target key end

     0   :  { %7 = vsyncpa [#allocation3], 0  ;;  %s191_s0 = inlined_call_operand.hbm [shape: f32[6,128], index: 0, kind: input, shape index: {}]   ;;  %s192_s1 = inlined_call_operand.hbm [shape: f32[6,128], index: 1, kind: input, shape index: {}]   ;;  %s193_s2 = inlined_call_operand.hbm [shape: f32[1,1], index: 2, kind: output, shape index: {}]  }
   0x1   :  { %8 = vsyncpa [#allocation6], 0 }
   0x2   :  { %9 = vsyncpa [#allocation4], 0  ;;  %s136_s9 = smov [#allocation2]   ;;  %s137_s11 = smov [#allocation5]  }
   0x3   :  { %s16_s10 = sshll.u32 %s136_s9, 4  ;;  %s26_s12 = sshll.u32 %s137_s11, 4  ;;  %s17_s10 = int_to_ptr.vmem [resolvable:$true] %s16_s10  ;;  %s27_s12 = int_to_ptr.vmem [resolvable:$true] %s26_s12 }
   0x4   :  { %s76_s15 = scalar_lea.hbm %s191_s0, 128 }
   0x5   :  { %p77_p0 = scmp.ne.s32.totalorder %s191_s0, %s76_s15  ;;  %p80_p1 = scmp.lt.u32.totalorder %s76_s15, %s191_s0 }
   0x7   :  { %p82_p2 = pnand %p80_p1, %p77_p0 }
   0x9   :  { %85 = shalt.err (!%p82_p2)
}
   0xa   :  { %s86_s20 = scalar_lea.vmem %s17_s10, 128  ;;  %p91_p4 = scmp.lt.s32.totalorder %s17_s10, %s17_s10 }
   0xb   :  { %p87_p3 = scmp.ne.s32.totalorder %s17_s10, %s86_s20  ;;  %p92_p5 = scmp.lt.s32.totalorder %s86_s20, %s86_s20 }
   0xd   :  { %p93_p6 = por %p92_p5, %p91_p4 }
   0xf   :  { %p94_p7 = pnand %p93_p6, %p87_p3 }
  0x11   :  { %97 = shalt.err (!%p94_p7)
}
  0x12   :  { %19 = dma.hbm_to_vmem [thread:$0]  %s191_s0, 128, %s17_s10, [#allocation3]  }
  0x13   :  { %s98_s25 = scalar_lea.hbm %s192_s1, 128 }
  0x14   :  { %p99_p8 = scmp.ne.s32.totalorder %s192_s1, %s98_s25  ;;  %p102_p9 = scmp.lt.u32.totalorder %s98_s25, %s192_s1 }
  0x16   :  { %p104_p10 = pnand %p102_p9, %p99_p8 }
  0x18   :  { %107 = shalt.err (!%p104_p10)
}
  0x19   :  { %s108_s30 = scalar_lea.vmem %s27_s12, 128  ;;  %p113_p12 = scmp.lt.s32.totalorder %s27_s12, %s27_s12 }
  0x1a   :  { %p109_p11 = scmp.ne.s32.totalorder %s27_s12, %s108_s30  ;;  %p114_p13 = scmp.lt.s32.totalorder %s108_s30, %s108_s30 }
  0x1c   :  { %p115_p0 = por %p114_p13, %p113_p12 }
  0x1e   :  { %p116_p1 = pnand %p115_p0, %p109_p11 }
  0x20   :  { %119 = shalt.err (!%p116_p1)
}
  0x21   :  { %29 = dma.hbm_to_vmem [thread:$0]  %s192_s1, 128, %s27_s12, [#allocation6]  }
  0x22   :  { %130 = dma.done.wait [#allocation3], 128  }
  0x23   :  { %131 = vsyncadd [#allocation3], 4294967168 }
  0x24   :  { %132 = dma.done.wait [#allocation6], 128  }
  0x25   :  { %133 = vsyncadd [#allocation6], 4294967168  ;;  %v36_v0 = vld [vmem:[#allocation2] sm:$0x3f]  ;;  %v37_v1 = vld [vmem:[#allocation5] sm:$0x3f] }
  0x26   :  { %v38_v2 = vsub.f32 %v36_v0, %v37_v1  ;;  %v138_v3 = vmov -0.7   ;;  %vm42_vm1 = vcmask 1045504   ;;  %s120_s6 = scalar_lea.hbm %s193_s2, 16 }
  0x27   :  { %p121_p2 = scmp.ne.s32.totalorder %s193_s2, %s120_s6  ;;  %p124_p3 = scmp.lt.u32.totalorder %s120_s6, %s193_s2 }
  0x28   :  { %vm39_vm0 = vcmp.ge.f32.partialorder %v38_v2, 0.0 }
  0x29   :  { %v40_v4 = vsel %vm39_vm0, 0.3, %v138_v3  ;;  %p126_p4 = pnand %p124_p3, %p121_p2 }
  0x2a   :  { %v41_v5 = vmul.f32 %v40_v4, %v38_v2 }
  0x2c   :  { %v43_v6 = vsel %vm42_vm1, %v41_v5, 0.0 }
  0x2d   :  { %44 = vadd.xlane.f32.xlu0 %v43_v6 }
  0xba   :  { %v45_v7 = vpop.xlane.xlu0 %44 }
  0xbb   :  { %v46_v8 = vrot.slane %v45_v7, 4 }
  0xbd   :  { %v47_v9 = vadd.f32 %v46_v8, %v45_v7 }
  0xbf   :  { %v48_v10 = vrot.slane %v47_v9, 2 }
  0xc1   :  { %v49_v11 = vadd.f32 %v48_v10, %v47_v9 }
  0xc3   :  { %v50_v12 = vrot.slane %v49_v11, 1 }
  0xc5   :  { %v51_v13 = vadd.f32 %v50_v12, %v49_v11 }
  0xc7   :  { %70 = vpush %v51_v13 }
  0xf8   :  { %s71_s1 = spop %70 }
  0xf9   :  { %54 = sst [smem:[#allocation7]] %s71_s1 }
  0xfa   :  { %129 = shalt.err (!%p126_p4)
}
  0xfb   :  { %s139_s11 = smov [#allocation7]  }
  0xfc   :  { %62 = dma.smem_to_hbm %s139_s11, 16, %s193_s2, [#allocation4]  }
  0xfd   :  { %134 = dma.done.wait [#allocation4], 16  }
  0xfe   :  { %135 = vsyncadd [#allocation4], 4294967280 }
  0xff   :  { %66 = sfence }
 0x100   :  { %67 = vsyncpa [#allocation3], 1 }
 0x101   :  { %68 = vsyncpa [#allocation6], 1 }
 0x102   :  { %69 = vsyncpa [#allocation4], 1 }

</bundles_post_ra>
